<compile_context>
chip_gen: v6e
topology: v6e:2x2x1
jax: 0.10.0
libtpu: 0.0.40
codegen_flags: <defaults>
</compile_context>

<pallas_src>
import jax
import jax.numpy as jnp
from jax.experimental import pallas as pl
from jax.experimental.pallas import tpu as pltpu

_LN_EPS = 1e-5  # torch.nn.LayerNorm default


def _round_up(x, m):
    return (x + m - 1) // m * m


def _tanh_layernorm(h_f32, gamma, beta):
    """LayerNorm(tanh(h)) * gamma + beta, f32 epilogue, one-pass variance."""
    t = jnp.tanh(h_f32)
    mean = jnp.mean(t, axis=-1, keepdims=True)
    mean_sq = jnp.mean(t * t, axis=-1, keepdims=True)
    var = jnp.maximum(mean_sq - mean * mean, 0.0)  # keep clamp (cancellation)
    return (t - mean) * jax.lax.rsqrt(var + _LN_EPS) * gamma + beta


def _ranker_kernel(
    # batch-tiled feature inputs
    rf_ref, cc_ref, com_ref, tit_ref, att_ref,
    # resident image-head params (weights pre-split along the concat axis)
    w_rf_ref, w_cc_ref, img_b_ref, img_g_ref, img_be_ref,
    # resident text-head params
    w_com_ref, w_tit_ref, w_att_ref, txt_b_ref, txt_g_ref, txt_be_ref,
    # single merged output: [block_b, 2*H]  (img | txt)
    out_ref,
):
    # Image head: concat fused as a sum of partial matmuls (MXU, f32 acc).
    img_h = (
        jnp.dot(rf_ref[...], w_rf_ref[...], preferred_element_type=jnp.float32)
        + jnp.dot(cc_ref[...], w_cc_ref[...], preferred_element_type=jnp.float32)
        + img_b_ref[...]
    )
    img = _tanh_layernorm(img_h, img_g_ref[...], img_be_ref[...])

    # Text head.
    txt_h = (
        jnp.dot(com_ref[...], w_com_ref[...], preferred_element_type=jnp.float32)
        + jnp.dot(tit_ref[...], w_tit_ref[...], preferred_element_type=jnp.float32)
        + jnp.dot(att_ref[...], w_att_ref[...], preferred_element_type=jnp.float32)
        + txt_b_ref[...]
    )
    txt = _tanh_layernorm(txt_h, txt_g_ref[...], txt_be_ref[...])

    # One wide lane-dense store: img in lanes [0:H), txt in lanes [H:2H).
    out_ref[...] = jnp.concatenate([img, txt], axis=-1).astype(out_ref.dtype)


def contextnet_ranker_forward(resnet_feats, context_classes, comments, titles,
                              attributes, params, *, block_b=None,
                              out_dtype=jnp.float32):
    """Fused (img_proj, text_proj) forward for ContextNetRanker's heads."""
    B = resnet_feats.shape[0]
    H = params["img_b"].shape[-1]

    if block_b is None:
        # Big tiles amortize the ~0.35 us per-grid-step overhead; the cap of
        # 512 keeps >=4 grid steps once B >= ~2k (megacore sharding on v7x)
        # and the whole double-buffered working set is <~3 MiB, far under the
        # scoped-VMEM default on every generation.
        block_b = max(8, min(512, _round_up(pl.cdiv(B, 4), 8)))
    assert block_b % 8 == 0, "batch tile must be a multiple of 8 sublanes"

    # No host-side padding / output slicing: Pallas masks the partial edge
    # block's reads and output writes.
    grid = (pl.cdiv(B, block_b),)

    feats = (resnet_feats, context_classes, comments, titles, attributes)

    def feat_spec(x):
        return pl.BlockSpec((block_b, x.shape[1]), lambda i: (i, 0))

    def resident_spec(x):
        # Whole array, same block every step -> stays resident in VMEM.
        return pl.BlockSpec(x.shape, lambda i: (0, 0))

    row = lambda v: v.reshape(1, -1)
    img_params = (params["w_rf"], params["w_cc"], row(params["img_b"]),
                  row(params["img_g"]), row(params["img_be"]))
    txt_params = (params["w_com"], params["w_tit"], params["w_att"],
                  row(params["txt_b"]), row(params["txt_g"]), row(params["txt_be"]))

    # Advisory cost hint: tiny, memory-bound custom call.
    img_in = params["w_rf"].shape[0] + params["w_cc"].shape[0]
    txt_in = (params["w_com"].shape[0] + params["w_tit"].shape[0]
              + params["w_att"].shape[0])
    in_bytes = B * sum(int(x.shape[1]) * x.dtype.itemsize for x in feats)
    w_bytes = sum(int(p.size) * p.dtype.itemsize for p in img_params + txt_params)
    out_bytes = B * 2 * H * jnp.dtype(out_dtype).itemsize
    cost = pl.CostEstimate(
        flops=int(2 * B * (img_in + txt_in) * H + 12 * B * 2 * H),
        transcendentals=int(2 * B * H),
        bytes_accessed=int(in_bytes + w_bytes + out_bytes),
    )

    out = pl.pallas_call(
        _ranker_kernel,
        out_shape=jax.ShapeDtypeStruct((B, 2 * H), out_dtype),
        grid_spec=pltpu.PrefetchScalarGridSpec(
            num_scalar_prefetch=0,
            grid=grid,
            in_specs=(
                [feat_spec(x) for x in feats]
                + [resident_spec(p) for p in img_params]
                + [resident_spec(p) for p in txt_params]
            ),
            out_specs=pl.BlockSpec((block_b, 2 * H), lambda i: (i, 0)),
        ),
        compiler_params=pltpu.CompilerParams(
            dimension_semantics=("parallel",),
            vmem_limit_bytes=32 * 1024 * 1024,
        ),
        cost_estimate=cost,
    )(*feats, *img_params, *txt_params)

    return out[:, :H], out[:, H:]


class ContextNetRankerPallas:
    """JAX/Pallas equivalent of ContextNetRanker's learned projection heads."""

    def __init__(self, key, resnet_features, context_net_out_dim,
                 comment_dim, title_dim, attr_dim, hidden_dim=128):
        img_in = resnet_features + context_net_out_dim
        txt_in = comment_dim + title_dim + attr_dim

        def linear_init(kw, kb, fan_in, fan_out):
            # torch.nn.Linear default: U(-1/sqrt(fan_in), 1/sqrt(fan_in))
            bound = 1.0 / float(fan_in) ** 0.5
            w = jax.random.uniform(kw, (fan_in, fan_out), jnp.float32, -bound, bound)
            b = jax.random.uniform(kb, (fan_out,), jnp.float32, -bound, bound)
            return w, b

        ks = jax.random.split(key, 4)
        img_w, img_b = linear_init(ks[0], ks[1], img_in, hidden_dim)
        txt_w, txt_b = linear_init(ks[2], ks[3], txt_in, hidden_dim)

        # Split the concatenated-layout weights along the input dim at init so
        # the torch.cat can be fused in-kernel as partial matmuls.
        self.params = dict(
            w_rf=img_w[:resnet_features],
            w_cc=img_w[resnet_features:],
            img_b=img_b,
            img_g=jnp.ones((hidden_dim,), jnp.float32),
            img_be=jnp.zeros((hidden_dim,), jnp.float32),
            w_com=txt_w[:comment_dim],
            w_tit=txt_w[comment_dim:comment_dim + title_dim],
            w_att=txt_w[comment_dim + title_dim:],
            txt_b=txt_b,
            txt_g=jnp.ones((hidden_dim,), jnp.float32),
            txt_be=jnp.zeros((hidden_dim,), jnp.float32),
        )
        # Concatenated copies kept only for the pure-JAX reference check.
        self._img_w, self._img_b = img_w, img_b
        self._txt_w, self._txt_b = txt_w, txt_b
        self.hidden_dim = hidden_dim

    def __call__(self, resnet_feats, context_classes, comments, titles,
                 attributes, *, block_b=None, out_dtype=jnp.float32):
        return contextnet_ranker_forward(
            resnet_feats, context_classes, comments, titles, attributes,
            self.params, block_b=block_b, out_dtype=out_dtype)


def _reference(model, rf, cc, com, tit, att):
    """Pure-JAX (torch-semantics) reference: cat -> Linear -> Tanh -> LayerNorm."""
    def head(x, w, b, g, be):
        t = jnp.tanh(x @ w + b)
        m = jnp.mean(t, axis=-1, keepdims=True)
        v = jnp.mean((t - m) ** 2, axis=-1, keepdims=True)
        return (t - m) / jnp.sqrt(v + _LN_EPS) * g + be

    p = model.params
    img = head(jnp.concatenate([rf, cc], -1), model._img_w, model._img_b,
               p["img_g"], p["img_be"])
    txt = head(jnp.concatenate([com, tit, att], -1), model._txt_w, model._txt_b,
               p["txt_g"], p["txt_be"])
    return img, txt


if __name__ == "__main__":
    key = jax.random.PRNGKey(0)
    k_params, k1, k2, k3, k4, k5 = jax.random.split(key, 6)

    # Small synthetic shapes consistent with the module's forward.
    B = 16
    resnet_features = 64
    context_net_out_dim = 16
    comment_dim = 32
    title_dim = 32
    attr_dim = 16
    hidden_dim = 128

    model = ContextNetRankerPallas(
        k_params, resnet_features, context_net_out_dim,
        comment_dim, title_dim, attr_dim, hidden_dim=hidden_dim)

    # Stand-ins for backbone / vectorizer outputs.
    resnet_feats = jax.random.normal(k1, (B, resnet_features), jnp.float32)
    context_classes = jax.nn.softmax(
        jax.random.normal(k2, (B, context_net_out_dim), jnp.float32), axis=-1)
    comments = jax.random.uniform(k3, (B, comment_dim), jnp.float32)   # tf-idf-like
    titles = jax.random.uniform(k4, (B, title_dim), jnp.float32)       # tf-idf-like
    attributes = (jax.random.uniform(k5, (B, attr_dim)) > 0.8).astype(jnp.float32)

    # --- Case 1: aligned batch (B=16, default block_b -> 2 grid steps). ---
    img_out, txt_out = model(resnet_feats, context_classes, comments, titles,
                             attributes)
    jax.block_until_ready((img_out, txt_out))
    img_ref, txt_ref = _reference(model, resnet_feats, context_classes,
                                  comments, titles, attributes)
    assert img_out.shape == (B, hidden_dim) and txt_out.shape == (B, hidden_dim)
    assert jnp.allclose(img_out, img_ref, atol=1e-4, rtol=1e-4)
    assert jnp.allclose(txt_out, txt_ref, atol=1e-4, rtol=1e-4)

    # --- Case 2: ragged batch (B=13) exercising the masked partial edge
    # block (no host-side pad / slice). ---
    Br = 13
    args_r = (resnet_feats[:Br], context_classes[:Br], comments[:Br],
              titles[:Br], attributes[:Br])
    img_r, txt_r = model(*args_r)
    jax.block_until_ready((img_r, txt_r))
    img_rr, txt_rr = _reference(model, *args_r)
    assert img_r.shape == (Br, hidden_dim) and txt_r.shape == (Br, hidden_dim)
    assert jnp.allclose(img_r, img_rr, atol=1e-4, rtol=1e-4)
    assert jnp.allclose(txt_r, txt_rr, atol=1e-4, rtol=1e-4)

    print("KERNEL_OK")
</pallas_src>

<mosaic_0001>
module attributes {stable_mosaic.version = 11 : i64} {
  func.func @_ranker_kernel(%arg0: i32, %arg1: memref<8x64xf32, #tpu.memory_space<vmem>>, %arg2: memref<8x16xf32, #tpu.memory_space<vmem>>, %arg3: memref<8x32xf32, #tpu.memory_space<vmem>>, %arg4: memref<8x32xf32, #tpu.memory_space<vmem>>, %arg5: memref<8x16xf32, #tpu.memory_space<vmem>>, %arg6: memref<64x128xf32, #tpu.memory_space<vmem>>, %arg7: memref<16x128xf32, #tpu.memory_space<vmem>>, %arg8: memref<1x128xf32, #tpu.memory_space<vmem>>, %arg9: memref<1x128xf32, #tpu.memory_space<vmem>>, %arg10: memref<1x128xf32, #tpu.memory_space<vmem>>, %arg11: memref<32x128xf32, #tpu.memory_space<vmem>>, %arg12: memref<32x128xf32, #tpu.memory_space<vmem>>, %arg13: memref<16x128xf32, #tpu.memory_space<vmem>>, %arg14: memref<1x128xf32, #tpu.memory_space<vmem>>, %arg15: memref<1x128xf32, #tpu.memory_space<vmem>>, %arg16: memref<1x128xf32, #tpu.memory_space<vmem>>, %arg17: memref<8x256xf32, #tpu.memory_space<vmem>>) attributes {dimension_semantics = [#tpu.dimension_semantics<parallel>], iteration_bounds = array<i64: 2>, scalar_prefetch = 0 : i64, scratch_operands = 0 : i64, tpu.core_type = #tpu.core_type<tc>, window_params = [{transform_indices = @transform_0, window_bounds = array<i64: 8, 64>}, {transform_indices = @transform_1, window_bounds = array<i64: 8, 16>}, {transform_indices = @transform_2, window_bounds = array<i64: 8, 32>}, {transform_indices = @transform_3, window_bounds = array<i64: 8, 32>}, {transform_indices = @transform_4, window_bounds = array<i64: 8, 16>}, {pipeline_mode = #tpu.pipeline_mode<synchronous>, transform_indices = @transform_5, window_bounds = array<i64: 64, 128>}, {pipeline_mode = #tpu.pipeline_mode<synchronous>, transform_indices = @transform_6, window_bounds = array<i64: 16, 128>}, {pipeline_mode = #tpu.pipeline_mode<synchronous>, transform_indices = @transform_7, window_bounds = array<i64: 1, 128>}, {pipeline_mode = #tpu.pipeline_mode<synchronous>, transform_indices = @transform_8, window_bounds = array<i64: 1, 128>}, {pipeline_mode = #tpu.pipeline_mode<synchronous>, transform_indices = @transform_9, window_bounds = array<i64: 1, 128>}, {pipeline_mode = #tpu.pipeline_mode<synchronous>, transform_indices = @transform_10, window_bounds = array<i64: 32, 128>}, {pipeline_mode = #tpu.pipeline_mode<synchronous>, transform_indices = @transform_11, window_bounds = array<i64: 32, 128>}, {pipeline_mode = #tpu.pipeline_mode<synchronous>, transform_indices = @transform_12, window_bounds = array<i64: 16, 128>}, {pipeline_mode = #tpu.pipeline_mode<synchronous>, transform_indices = @transform_13, window_bounds = array<i64: 1, 128>}, {pipeline_mode = #tpu.pipeline_mode<synchronous>, transform_indices = @transform_14, window_bounds = array<i64: 1, 128>}, {pipeline_mode = #tpu.pipeline_mode<synchronous>, transform_indices = @transform_15, window_bounds = array<i64: 1, 128>}, {transform_indices = @transform_16, window_bounds = array<i64: 8, 256>}]} {
    %c0 = arith.constant 0 : index
    %c0_0 = arith.constant 0 : index
    %0 = vector.load %arg1[%c0, %c0_0] : memref<8x64xf32, #tpu.memory_space<vmem>>, vector<8x64xf32>
    %c0_1 = arith.constant 0 : index
    %c0_2 = arith.constant 0 : index
    %1 = vector.load %arg6[%c0_1, %c0_2] : memref<64x128xf32, #tpu.memory_space<vmem>>, vector<64x128xf32>
    %cst = arith.constant dense<0.000000e+00> : vector<8x128xf32>
    %2 = tpu.matmul %0, %1, %cst {dimension_numbers = #tpu.dot_dimension_numbers<[1], [0], [0], [1], [0, 0, 1, 1], [], []>} : vector<8x64xf32>, vector<64x128xf32>, vector<8x128xf32> -> vector<8x128xf32>
    %c0_3 = arith.constant 0 : index
    %c0_4 = arith.constant 0 : index
    %3 = vector.load %arg2[%c0_3, %c0_4] : memref<8x16xf32, #tpu.memory_space<vmem>>, vector<8x16xf32>
    %c0_5 = arith.constant 0 : index
    %c0_6 = arith.constant 0 : index
    %4 = vector.load %arg7[%c0_5, %c0_6] : memref<16x128xf32, #tpu.memory_space<vmem>>, vector<16x128xf32>
    %cst_7 = arith.constant dense<0.000000e+00> : vector<8x128xf32>
    %5 = tpu.matmul %3, %4, %cst_7 {dimension_numbers = #tpu.dot_dimension_numbers<[1], [0], [0], [1], [0, 0, 1, 1], [], []>} : vector<8x16xf32>, vector<16x128xf32>, vector<8x128xf32> -> vector<8x128xf32>
    %6 = arith.addf %2, %5 : vector<8x128xf32>
    %c0_8 = arith.constant 0 : index
    %c0_9 = arith.constant 0 : index
    %7 = vector.load %arg8[%c0_8, %c0_9] : memref<1x128xf32, #tpu.memory_space<vmem>>, vector<1x128xf32>
    %8 = vector.broadcast %7 : vector<1x128xf32> to vector<8x128xf32>
    %9 = arith.addf %6, %8 : vector<8x128xf32>
    %c0_10 = arith.constant 0 : index
    %c0_11 = arith.constant 0 : index
    %10 = vector.load %arg9[%c0_10, %c0_11] : memref<1x128xf32, #tpu.memory_space<vmem>>, vector<1x128xf32>
    %c0_12 = arith.constant 0 : index
    %c0_13 = arith.constant 0 : index
    %11 = vector.load %arg10[%c0_12, %c0_13] : memref<1x128xf32, #tpu.memory_space<vmem>>, vector<1x128xf32>
    %12 = math.tanh %9 : vector<8x128xf32>
    %cst_14 = arith.constant dense<0.000000e+00> : vector<8xf32>
    %13 = vector.multi_reduction <add>, %12, %cst_14 [1] : vector<8x128xf32> to vector<8xf32>
    %14 = vector.shape_cast %13 : vector<8xf32> to vector<8x1xf32>
    %cst_15 = arith.constant 1.280000e+02 : f32
    %15 = vector.broadcast %cst_15 : f32 to vector<8x1xf32>
    %16 = arith.divf %14, %15 : vector<8x1xf32>
    %17 = arith.mulf %12, %12 : vector<8x128xf32>
    %cst_16 = arith.constant dense<0.000000e+00> : vector<8xf32>
    %18 = vector.multi_reduction <add>, %17, %cst_16 [1] : vector<8x128xf32> to vector<8xf32>
    %19 = vector.shape_cast %18 : vector<8xf32> to vector<8x1xf32>
    %cst_17 = arith.constant 1.280000e+02 : f32
    %20 = vector.broadcast %cst_17 : f32 to vector<8x1xf32>
    %21 = arith.divf %19, %20 : vector<8x1xf32>
    %22 = arith.mulf %16, %16 : vector<8x1xf32>
    %23 = arith.subf %21, %22 : vector<8x1xf32>
    %cst_18 = arith.constant 0.000000e+00 : f32
    %24 = vector.broadcast %cst_18 : f32 to vector<8x1xf32>
    %25 = arith.maximumf %23, %24 : vector<8x1xf32>
    %26 = vector.broadcast %16 : vector<8x1xf32> to vector<8x128xf32>
    %27 = arith.subf %12, %26 : vector<8x128xf32>
    %cst_19 = arith.constant 9.99999974E-6 : f32
    %28 = vector.broadcast %cst_19 : f32 to vector<8x1xf32>
    %29 = arith.addf %25, %28 : vector<8x1xf32>
    %30 = math.rsqrt %29 : vector<8x1xf32>
    %31 = vector.broadcast %30 : vector<8x1xf32> to vector<8x128xf32>
    %32 = arith.mulf %27, %31 : vector<8x128xf32>
    %33 = vector.broadcast %10 : vector<1x128xf32> to vector<8x128xf32>
    %34 = arith.mulf %32, %33 : vector<8x128xf32>
    %35 = vector.broadcast %11 : vector<1x128xf32> to vector<8x128xf32>
    %36 = arith.addf %34, %35 : vector<8x128xf32>
    %c0_20 = arith.constant 0 : index
    %c0_21 = arith.constant 0 : index
    %37 = vector.load %arg3[%c0_20, %c0_21] : memref<8x32xf32, #tpu.memory_space<vmem>>, vector<8x32xf32>
    %c0_22 = arith.constant 0 : index
    %c0_23 = arith.constant 0 : index
    %38 = vector.load %arg11[%c0_22, %c0_23] : memref<32x128xf32, #tpu.memory_space<vmem>>, vector<32x128xf32>
    %cst_24 = arith.constant dense<0.000000e+00> : vector<8x128xf32>
    %39 = tpu.matmul %37, %38, %cst_24 {dimension_numbers = #tpu.dot_dimension_numbers<[1], [0], [0], [1], [0, 0, 1, 1], [], []>} : vector<8x32xf32>, vector<32x128xf32>, vector<8x128xf32> -> vector<8x128xf32>
    %c0_25 = arith.constant 0 : index
    %c0_26 = arith.constant 0 : index
    %40 = vector.load %arg4[%c0_25, %c0_26] : memref<8x32xf32, #tpu.memory_space<vmem>>, vector<8x32xf32>
    %c0_27 = arith.constant 0 : index
    %c0_28 = arith.constant 0 : index
    %41 = vector.load %arg12[%c0_27, %c0_28] : memref<32x128xf32, #tpu.memory_space<vmem>>, vector<32x128xf32>
    %cst_29 = arith.constant dense<0.000000e+00> : vector<8x128xf32>
    %42 = tpu.matmul %40, %41, %cst_29 {dimension_numbers = #tpu.dot_dimension_numbers<[1], [0], [0], [1], [0, 0, 1, 1], [], []>} : vector<8x32xf32>, vector<32x128xf32>, vector<8x128xf32> -> vector<8x128xf32>
    %43 = arith.addf %39, %42 : vector<8x128xf32>
    %c0_30 = arith.constant 0 : index
    %c0_31 = arith.constant 0 : index
    %44 = vector.load %arg5[%c0_30, %c0_31] : memref<8x16xf32, #tpu.memory_space<vmem>>, vector<8x16xf32>
    %c0_32 = arith.constant 0 : index
    %c0_33 = arith.constant 0 : index
    %45 = vector.load %arg13[%c0_32, %c0_33] : memref<16x128xf32, #tpu.memory_space<vmem>>, vector<16x128xf32>
    %cst_34 = arith.constant dense<0.000000e+00> : vector<8x128xf32>
    %46 = tpu.matmul %44, %45, %cst_34 {dimension_numbers = #tpu.dot_dimension_numbers<[1], [0], [0], [1], [0, 0, 1, 1], [], []>} : vector<8x16xf32>, vector<16x128xf32>, vector<8x128xf32> -> vector<8x128xf32>
    %47 = arith.addf %43, %46 : vector<8x128xf32>
    %c0_35 = arith.constant 0 : index
    %c0_36 = arith.constant 0 : index
    %48 = vector.load %arg14[%c0_35, %c0_36] : memref<1x128xf32, #tpu.memory_space<vmem>>, vector<1x128xf32>
    %49 = vector.broadcast %48 : vector<1x128xf32> to vector<8x128xf32>
    %50 = arith.addf %47, %49 : vector<8x128xf32>
    %c0_37 = arith.constant 0 : index
    %c0_38 = arith.constant 0 : index
    %51 = vector.load %arg15[%c0_37, %c0_38] : memref<1x128xf32, #tpu.memory_space<vmem>>, vector<1x128xf32>
    %c0_39 = arith.constant 0 : index
    %c0_40 = arith.constant 0 : index
    %52 = vector.load %arg16[%c0_39, %c0_40] : memref<1x128xf32, #tpu.memory_space<vmem>>, vector<1x128xf32>
    %53 = math.tanh %50 : vector<8x128xf32>
    %cst_41 = arith.constant dense<0.000000e+00> : vector<8xf32>
    %54 = vector.multi_reduction <add>, %53, %cst_41 [1] : vector<8x128xf32> to vector<8xf32>
    %55 = vector.shape_cast %54 : vector<8xf32> to vector<8x1xf32>
    %cst_42 = arith.constant 1.280000e+02 : f32
    %56 = vector.broadcast %cst_42 : f32 to vector<8x1xf32>
    %57 = arith.divf %55, %56 : vector<8x1xf32>
    %58 = arith.mulf %53, %53 : vector<8x128xf32>
    %cst_43 = arith.constant dense<0.000000e+00> : vector<8xf32>
    %59 = vector.multi_reduction <add>, %58, %cst_43 [1] : vector<8x128xf32> to vector<8xf32>
    %60 = vector.shape_cast %59 : vector<8xf32> to vector<8x1xf32>
    %cst_44 = arith.constant 1.280000e+02 : f32
    %61 = vector.broadcast %cst_44 : f32 to vector<8x1xf32>
    %62 = arith.divf %60, %61 : vector<8x1xf32>
    %63 = arith.mulf %57, %57 : vector<8x1xf32>
    %64 = arith.subf %62, %63 : vector<8x1xf32>
    %cst_45 = arith.constant 0.000000e+00 : f32
    %65 = vector.broadcast %cst_45 : f32 to vector<8x1xf32>
    %66 = arith.maximumf %64, %65 : vector<8x1xf32>
    %67 = vector.broadcast %57 : vector<8x1xf32> to vector<8x128xf32>
    %68 = arith.subf %53, %67 : vector<8x128xf32>
    %cst_46 = arith.constant 9.99999974E-6 : f32
    %69 = vector.broadcast %cst_46 : f32 to vector<8x1xf32>
    %70 = arith.addf %66, %69 : vector<8x1xf32>
    %71 = math.rsqrt %70 : vector<8x1xf32>
    %72 = vector.broadcast %71 : vector<8x1xf32> to vector<8x128xf32>
    %73 = arith.mulf %68, %72 : vector<8x128xf32>
    %74 = vector.broadcast %51 : vector<1x128xf32> to vector<8x128xf32>
    %75 = arith.mulf %73, %74 : vector<8x128xf32>
    %76 = vector.broadcast %52 : vector<1x128xf32> to vector<8x128xf32>
    %77 = arith.addf %75, %76 : vector<8x128xf32>
    %78 = tpu.concatenate %36, %77 in 1 : vector<8x128xf32>, vector<8x128xf32> -> vector<8x256xf32>
    %c0_47 = arith.constant 0 : index
    %c0_48 = arith.constant 0 : index
    %79 = vector.load %arg17[%c0_47, %c0_48] : memref<8x256xf32, #tpu.memory_space<vmem>>, vector<8x256xf32>
    tpu.vector_store %arg17[%c0_47, %c0_48], %78 {strides = array<i32>} : memref<8x256xf32, #tpu.memory_space<vmem>>, vector<8x256xf32>,
    return
  }
  func.func @transform_0(%arg0: i32) -> (i32, i32) {
    %c0_i32 = arith.constant 0 : i32
    %c0_i32_0 = arith.constant 0 : i32
    return %arg0, %c0_i32 : i32, i32
  }
  func.func @transform_1(%arg0: i32) -> (i32, i32) {
    %c0_i32 = arith.constant 0 : i32
    %c0_i32_0 = arith.constant 0 : i32
    return %arg0, %c0_i32 : i32, i32
  }
  func.func @transform_2(%arg0: i32) -> (i32, i32) {
    %c0_i32 = arith.constant 0 : i32
    %c0_i32_0 = arith.constant 0 : i32
    return %arg0, %c0_i32 : i32, i32
  }
  func.func @transform_3(%arg0: i32) -> (i32, i32) {
    %c0_i32 = arith.constant 0 : i32
    %c0_i32_0 = arith.constant 0 : i32
    return %arg0, %c0_i32 : i32, i32
  }
  func.func @transform_4(%arg0: i32) -> (i32, i32) {
    %c0_i32 = arith.constant 0 : i32
    %c0_i32_0 = arith.constant 0 : i32
    return %arg0, %c0_i32 : i32, i32
  }
  func.func @transform_5(%arg0: i32) -> (i32, i32) {
    %c0_i32 = arith.constant 0 : i32
    %c0_i32_0 = arith.constant 0 : i32
    %c0_i32_1 = arith.constant 0 : i32
    return %c0_i32, %c0_i32_0 : i32, i32
  }
  func.func @transform_6(%arg0: i32) -> (i32, i32) {
    %c0_i32 = arith.constant 0 : i32
    %c0_i32_0 = arith.constant 0 : i32
    %c0_i32_1 = arith.constant 0 : i32
    return %c0_i32, %c0_i32_0 : i32, i32
  }
  func.func @transform_7(%arg0: i32) -> (i32, i32) {
    %c0_i32 = arith.constant 0 : i32
    %c0_i32_0 = arith.constant 0 : i32
    %c0_i32_1 = arith.constant 0 : i32
    return %c0_i32, %c0_i32_0 : i32, i32
  }
  func.func @transform_8(%arg0: i32) -> (i32, i32) {
    %c0_i32 = arith.constant 0 : i32
    %c0_i32_0 = arith.constant 0 : i32
    %c0_i32_1 = arith.constant 0 : i32
    return %c0_i32, %c0_i32_0 : i32, i32
  }
  func.func @transform_9(%arg0: i32) -> (i32, i32) {
    %c0_i32 = arith.constant 0 : i32
    %c0_i32_0 = arith.constant 0 : i32
    %c0_i32_1 = arith.constant 0 : i32
    return %c0_i32, %c0_i32_0 : i32, i32
  }
  func.func @transform_10(%arg0: i32) -> (i32, i32) {
    %c0_i32 = arith.constant 0 : i32
    %c0_i32_0 = arith.constant 0 : i32
    %c0_i32_1 = arith.constant 0 : i32
    return %c0_i32, %c0_i32_0 : i32, i32
  }
  func.func @transform_11(%arg0: i32) -> (i32, i32) {
    %c0_i32 = arith.constant 0 : i32
    %c0_i32_0 = arith.constant 0 : i32
    %c0_i32_1 = arith.constant 0 : i32
    return %c0_i32, %c0_i32_0 : i32, i32
  }
  func.func @transform_12(%arg0: i32) -> (i32, i32) {
    %c0_i32 = arith.constant 0 : i32
    %c0_i32_0 = arith.constant 0 : i32
    %c0_i32_1 = arith.constant 0 : i32
    return %c0_i32, %c0_i32_0 : i32, i32
  }
  func.func @transform_13(%arg0: i32) -> (i32, i32) {
    %c0_i32 = arith.constant 0 : i32
    %c0_i32_0 = arith.constant 0 : i32
    %c0_i32_1 = arith.constant 0 : i32
    return %c0_i32, %c0_i32_0 : i32, i32
  }
  func.func @transform_14(%arg0: i32) -> (i32, i32) {
    %c0_i32 = arith.constant 0 : i32
    %c0_i32_0 = arith.constant 0 : i32
    %c0_i32_1 = arith.constant 0 : i32
    return %c0_i32, %c0_i32_0 : i32, i32
  }
  func.func @transform_15(%arg0: i32) -> (i32, i32) {
    %c0_i32 = arith.constant 0 : i32
    %c0_i32_0 = arith.constant 0 : i32
    %c0_i32_1 = arith.constant 0 : i32
    return %c0_i32, %c0_i32_0 : i32, i32
  }
  func.func @transform_16(%arg0: i32) -> (i32, i32) {
    %c0_i32 = arith.constant 0 : i32
    %c0_i32_0 = arith.constant 0 : i32
    return %arg0, %c0_i32 : i32, i32
  }
}

</mosaic_0001>

<bundles_post_ra>
// kernel: tpu_custom_call.1
= control target key start
LH: loop header
LB: loop body
LE: loop exit
PB: predicated region body
PF: predicated region fallthrough
CT: control target
= control target key end

     0   :  { %s2493_s0 = inlined_call_operand.hbm [shape: f32[16,64], index: 0, kind: input, shape index: {}]   ;;  %s2494_s1 = inlined_call_operand.hbm [shape: f32[16,16], index: 1, kind: input, shape index: {}]   ;;  %s2495_s2 = inlined_call_operand.hbm [shape: f32[16,32], index: 2, kind: input, shape index: {}]   ;;  %s2496_s3 = inlined_call_operand.hbm [shape: f32[16,32], index: 3, kind: input, shape index: {}]   ;;  %s2497_s4 = inlined_call_operand.hbm [shape: f32[16,16], index: 4, kind: input, shape index: {}]   ;;  %s2498_s5 = inlined_call_operand.hbm [shape: f32[64,128], index: 5, kind: input, shape index: {}]   ;;  %s2499_s6 = inlined_call_operand.hbm [shape: f32[16,128], index: 6, kind: input, shape index: {}]   ;;  %s2500_s7 = inlined_call_operand.vmem [shape: f32[1,128], index: 7, kind: input, shape index: {}]   ;;  %s2501_s8 = inlined_call_operand.vmem [shape: f32[1,128], index: 8, kind: input, shape index: {}]   ;;  %s2502_s9 = inlined_call_operand.vmem [shape: f32[1,128], index: 9, kind: input, shape index: {}]   ;;  %s2503_s10 = inlined_call_operand.hbm [shape: f32[32,128], index: 10, kind: input, shape index: {}]   ;;  %s2504_s11 = inlined_call_operand.hbm [shape: f32[32,128], index: 11, kind: input, shape index: {}]   ;;  %s2505_s12 = inlined_call_operand.vmem [shape: f32[16,128], index: 12, kind: input, shape index: {}]   ;;  %s2506_s13 = inlined_call_operand.vmem [shape: f32[1,128], index: 13, kind: input, shape index: {}]   ;;  %s2507_s14 = inlined_call_operand.vmem [shape: f32[1,128], index: 14, kind: input, shape index: {}]   ;;  %s2508_s15 = inlined_call_operand.vmem [shape: f32[1,128], index: 15, kind: input, shape index: {}]   ;;  %s2509_s16 = inlined_call_operand.hbm [shape: f32[16,256], index: 16, kind: output, shape index: {}]  }
   0x1   :  { %2531 = sst [smem:[#allocation29_spill]] %s2493_s0 }
   0x2   :  { %2532 = sst [smem:[#allocation30_spill]] %s2494_s1 }
   0x3   :  { %2533 = sst [smem:[#allocation31_spill]] %s2496_s3 }
   0x4   :  { %2534 = sst [smem:[#allocation32_spill]] %s2498_s5 }
   0x5   :  { %2535 = sst [smem:[#allocation33_spill]] %s2499_s6 }
   0x6   :  { %2536 = sst [smem:[#allocation34_spill]] %s2500_s7 }
   0x7   :  { %2537 = sst [smem:[#allocation35_spill]] %s2501_s8 }
   0x8   :  { %2538 = sst [smem:[#allocation36_spill]] %s2502_s9 }
   0x9   :  { %2539 = sst [smem:[#allocation37_spill]] %s2503_s10 }
   0xa   :  { %2540 = sst [smem:[#allocation38_spill]] %s2504_s11 }
   0xb   :  { %2541 = sst [smem:[#allocation39_spill]] %s2506_s13 }
   0xc   :  { %2542 = sst [smem:[#allocation40_spill]] %s2507_s14 }
   0xd   :  { %2543 = sst [smem:[#allocation41_spill]] %s2508_s15 }
   0xe   :  { %2544 = sst [smem:[#allocation42_spill]] %s2509_s16 }
   0xf   :  { %21 = vsyncpa [#allocation3], 0 }
  0x10   :  { %23 = vsyncpa [#allocation3 + $0x1], 0 }
  0x11   :  { %24 = vsyncpa [#allocation6], 0 }
  0x12   :  { %26 = vsyncpa [#allocation6 + $0x1], 0 }
  0x13   :  { %27 = vsyncpa [#allocation9], 0 }
  0x14   :  { %29 = vsyncpa [#allocation9 + $0x1], 0 }
  0x15   :  { %30 = vsyncpa [#allocation12], 0 }
  0x16   :  { %31 = vsyncpa [#allocation15], 0 }
  0x17   :  { %32 = vsyncpa [#allocation4], 0 }
  0x18   :  { %34 = vsyncpa [#allocation4 + $0x1], 0  ;;  %s2090_s21 = smov 0   ;;  %s2092_s22 = smov 0  }
  0x19   :  { %s2094_s23 = smov 0   ;;  %s2096_s24 = smov 0  }
  0x1a LB: > { %2545 = sst [smem:[#allocation24_spill]] %s1977_s21  ;;  %s2111_s25 = sadd.s32 4294967295, %s1989_s24   ;;  %s1989_s24 = sphi %s2096_s24, %s2590_s24   ;;  %s1985_s23 = sphi %s2094_s23, %s2594_s23   ;;  %s1981_s22 = sphi %s2092_s22, %s2593_s22   ;;  %s1977_s21 = sphi %s2090_s21, %s2592_s21  }
  0x1b   : > { %s1421_s26 = sadd.s32 4294967294, %s1989_s24   ;;  %p60_p0 = scmp.ne.s32.totalorder %s1981_s22, %s1977_s21 }
  0x1c   : > { %p2523_p1 = scmp.eq.s32.totalorder %s2111_s25, 0  ;;  %p419_p2 = scmp.eq.s32.totalorder %s2111_s25, 1 }
  0x1d   : > { %p425_p3 = scmp.eq.s32.totalorder %s1421_s26, 1  ;;  %p1422_p5 = scmp.ge.s32.totalorder %s1989_s24, 1 }
  0x1e   : > { %p2120_p4 = por %p2523_p1, %p60_p0  ;;  %p432_p7 = scmp.lt.s32.totalorder %s1989_s24, 3 }
  0x1f   : > { %p2125_p6 = por %p425_p3, %p60_p0  ;;  %s1991_s30 = smov [#allocation11]  }
  0x20   : > { %s2546_s27 = scalar_select %p2120_p4, 1, 0 }
  0x21   : > { %s2547_s28 = scalar_select %p2125_p6, 1, 0 }
  0x22   : > { %p2130_p8 = pnand %p1422_p5, %p432_p7  ;;  %s444_s0 = sshll.u32 %s1991_s30, 4  ;;  %s445_s0 = int_to_ptr.vmem [resolvable:$true] %s444_s0 }
  0x23   : > { %2548 = sst [smem:[#allocation25_spill]] %s2547_s28  ;;  %s1992_s18 = smov [#allocation14]  }
  0x24   : > { %s2549_s29 = scalar_select %p2130_p8, 1, 0 }
  0x25   : > { %p1574_p9 = pneg %p2130_p8  ;;  %s479_s19 = sshll.u32 %s1992_s18, 4  ;;  %s480_s19 = int_to_ptr.vmem [resolvable:$true] %s479_s19 }
  0x26   : > { %s1676_s20 = scalar_lea.vmem %s445_s0, 1024  ;;  %p1684_p5 = scmp.lt.s32.totalorder %s445_s0, %s445_s0 }
  0x27   : > { %p2139_p11 = pnand %p1574_p9, %p2523_p1  ;;  %p1677_p13 = scmp.ne.s32.totalorder %s445_s0, %s1676_s20 }
  0x28   : > { %p1685_p7 = scmp.lt.s32.totalorder %s1676_s20, %s1676_s20 }
  0x29   : > { %s2550_s17 = scalar_select %p2139_p11, 1, 0 }
  0x2a   : > { %p2524_p12 = pneg %p2139_p11  ;;  %p1686_p10 = por %p1685_p7, %p1684_p5 }
  0x2c   : > { %p1679_p0 = pnand %p1677_p13, %p2524_p12 }
  0x2e   : > { %p1680_p3 = pneg %p1679_p0 }
  0x30   : > { %p1687_p9 = pnand %p1686_p10, %p1680_p3 }
  0x32   : > { %1690 = shalt.err (!%p1687_p9)
}
  0x33   : > { %s2514_s26 = smov 128   ;;  %s2516_s30 = smov 8  }
  0x34   : > { %s2551_s5 = sld [smem:[#allocation32_spill]]  ;;  %s1702_s21 = scalar_lea.vmem %s480_s19, 512 }
  0x35   : > { %p1703_p13 = scmp.ne.s32.totalorder %s480_s19, %s1702_s21  ;;  %p1710_p10 = scmp.lt.s32.totalorder %s480_s19, %s480_s19 }
  0x36   : > { %p1711_p3 = scmp.lt.s32.totalorder %s1702_s21, %s1702_s21 }
  0x37   : > { %p1705_p0 = pnand %p1703_p13, %p2524_p12 }
  0x38   : > { %p1712_p7 = por %p1711_p3, %p1710_p10 }
  0x39   : > { %p1706_p5 = pneg %p1705_p0 }
  0x3a   : > { %1577 = dma.hbm_to_vmem [thread:$0]  (!%p2139_p11), %s2551_s5, 1024, %s445_s0, [#allocation12], %s2514_s26, %s2514_s26, %s2516_s30  }
  0x3b   : > { %p1713_p9 = pnand %p1712_p7, %p1706_p5 }
  0x3d   : > { %1716 = shalt.err (!%p1713_p9)
}
  0x3e   : > { %s2552_s10 = sld [smem:[#allocation37_spill]]  ;;  %s2168_s21 = sadd.s32 1, %s1989_s24  }
  0x3f   : > { %2553 = sst [smem:[#allocation26_spill]] %s2168_s21  ;;  %s47_s28 = sadd.s32 1, %s1985_s23 }
  0x40   : > { %s44_s0 = ssub.s32 %s1989_s24, %s2168_s21  ;;  %p54_p13 = scmp.ne.s32.totalorder %s1985_s23, %s1981_s22 }
  0x41   : > { %p45_p0 = scmp.eq.s32.totalorder %s44_s0, 0  ;;  %p55_p5 = scmp.eq.s32.totalorder %s1989_s24, 0 }
  0x42   : > { %p2178_p10 = por %p419_p2, %p54_p13  ;;  %p1611_p3 = scmp.lt.s32.totalorder %s1989_s24, 2 }
  0x43   : > { %s2184_s18 = scalar_select %p45_p0, %s1985_s23, %s47_s28  }
  0x44   : > { %1583 = dma.hbm_to_vmem [thread:$0]  (!%p2139_p11), %s2552_s10, 512, %s480_s19, [#allocation15], %s2514_s26, %s2514_s26, %s2516_s30  }
  0x45   : > { %s2554_s16 = scalar_select %p2178_p10, 1, 0 }
  0x46   : > { %2556 = sst [smem:[#allocation28_spill]] %s2184_s18  ;;  %p56_p7 = por %p55_p5, %p54_p13 }
  0x47   : > { %2555 = sst [smem:[#allocation27_spill]] %s2554_s16  ;;  %s2518_s20 = sand.u32 1, %s1985_s23  }
  0x48   : > { %s2189_s19 = sshll.u32 %s2518_s20, 3  ;;  %s2192_s26 = sshll.u32 %s1989_s24, 7 }
  0x49   : > { %p2194_p9 = pnand %p1611_p3, %p56_p7  ;;  %s2525_s30 = sand.u32 1, %s1989_s24  }
  0x4a   : > { %s2558_s1 = sld [smem:[#allocation30_spill]]  ;;  %s540_s20 = scalar_lea.vmem [#allocation5], %s2189_s19 }
  0x4b   : > { %s547_s18 = sshll.u32 %s540_s20, 4  ;;  %s2208_s21 = scalar_lea.sflag [#allocation6], %s2525_s30  ;;  %s548_s18 = int_to_ptr.vmem [resolvable:$true] %s547_s18 }
  0x4c   : > { %p2214_p13 = pneg %p2194_p9 }
  0x50   : > { %s2203_s28 = scalar_lea.hbm %s2558_s1, %s2192_s26  ;;  %s1722_s16 = scalar_lea.hbm %s2558_s1, 256 }
  0x51   : > { %s1717_s15 = scalar_lea.hbm %s2203_s28, 128  ;;  %p1723_p3 = scmp.lt.s32.totalorder %s2203_s28, %s2558_s1 }
  0x52   : > { %p1718_p2 = scmp.ne.s32.totalorder %s2203_s28, %s1717_s15  ;;  %p1724_p7 = scmp.lt.s32.totalorder %s1722_s16, %s1717_s15 }
  0x54   : > { %p1720_p0 = pnand %p2214_p13, %p1718_p2  ;;  %p1725_p1 = por %p1724_p7, %p1723_p3 }
  0x56   : > { %p1721_p5 = pneg %p1720_p0 }
  0x58   : > { %p1726_p12 = pnand %p1725_p1, %p1721_p5 }
  0x5a   : > { %1729 = shalt.err (!%p1726_p12)
}
  0x5b   : > { %s1730_s30 = scalar_lea.vmem %s548_s18, 128  ;;  %s1995_s8 = smov [#allocation5]  }
  0x5c   : > { %p1731_p6 = scmp.ne.s32.totalorder %s548_s18, %s1730_s30  ;;  %s1735_s13 = sshll.u32 %s1995_s8, 4  ;;  %s1736_s13 = int_to_ptr.vmem [resolvable:$false] %s1735_s13 }
  0x5d   : > { %s1737_s7 = scalar_lea.vmem %s1736_s13, 256  ;;  %p1738_p2 = scmp.lt.s32.totalorder %s548_s18, %s1736_s13 }
  0x5e   : > { %p1733_p10 = pnand %p1731_p6, %p2214_p13  ;;  %p1739_p0 = scmp.lt.s32.totalorder %s1737_s7, %s1730_s30 }
  0x60   : > { %p1734_p4 = pneg %p1733_p10  ;;  %p1740_p8 = por %p1739_p0, %p1738_p2 }
  0x62   : > { %p1741_p11 = pnand %p1740_p8, %p1734_p4 }
  0x64   : > { %1744 = shalt.err (!%p1741_p11)
}
  0x65   : > { %1593 = dma.hbm_to_vmem [thread:$0]  (!%p2194_p9), %s2203_s28, 128, %s548_s18, %s2208_s21  }
  0x66   : > { %s2560_s3 = sld [smem:[#allocation31_spill]]  ;;  %s576_s7 = scalar_lea.vmem [#allocation8], %s2189_s19 }
  0x67   : > { %s583_s13 = sshll.u32 %s576_s7, 4  ;;  %s2561_s30 = sand.u32 1, %s1989_s24   ;;  %s584_s13 = int_to_ptr.vmem [resolvable:$true] %s583_s13 }
  0x68   : > { %s2242_s16 = scalar_lea.sflag [#allocation9], %s2561_s30 }
  0x6c   : > { %s2237_s8 = scalar_lea.hbm %s2560_s3, %s2192_s26  ;;  %s1750_s10 = scalar_lea.hbm %s2560_s3, 256 }
  0x6d   : > { %s1745_s5 = scalar_lea.hbm %s2237_s8, 128  ;;  %p1751_p8 = scmp.lt.s32.totalorder %s2237_s8, %s2560_s3 }
  0x6e   : > { %p1746_p1 = scmp.ne.s32.totalorder %s2237_s8, %s1745_s5  ;;  %p1752_p11 = scmp.lt.s32.totalorder %s1750_s10, %s1745_s5 }
  0x70   : > { %p1748_p4 = pnand %p1746_p1, %p2214_p13  ;;  %p1753_p12 = por %p1752_p11, %p1751_p8 }
  0x72   : > { %p1749_p6 = pneg %p1748_p4 }
  0x74   : > { %p1754_p10 = pnand %p1753_p12, %p1749_p6 }
  0x76   : > { %1757 = shalt.err (!%p1754_p10)
}
  0x77   : > { %s1758_s15 = scalar_lea.vmem %s584_s13, 128  ;;  %s1996_s7 = smov [#allocation8]  }
  0x78   : > { %p1759_p5 = scmp.ne.s32.totalorder %s584_s13, %s1758_s15  ;;  %s1763_s30 = sshll.u32 %s1996_s7, 4  ;;  %s1764_s30 = int_to_ptr.vmem [resolvable:$false] %s1763_s30 }
  0x79   : > { %s1765_s1 = scalar_lea.vmem %s1764_s30, 256  ;;  %p1766_p2 = scmp.lt.s32.totalorder %s584_s13, %s1764_s30 }
  0x7a   : > { %p1761_p3 = pnand %p1759_p5, %p2214_p13  ;;  %p1767_p0 = scmp.lt.s32.totalorder %s1765_s1, %s1758_s15 }
  0x7c   : > { %p1762_p7 = pneg %p1761_p3  ;;  %p1768_p1 = por %p1767_p0, %p1766_p2 }
  0x7e   : > { %p1769_p4 = pnand %p1768_p1, %p1762_p7 }
  0x80   : > { %1772 = shalt.err (!%p1769_p4)
}
  0x81   : > { %1599 = dma.hbm_to_vmem [thread:$0]  (!%p2194_p9), %s2237_s8, 128, %s584_s13, %s2242_s16  }
  0x82   : > { %s1997_s5 = smov [#allocation13]   ;;  %s1998_s28 = smov [#allocation16]  }
  0x83   : > { %s457_s18 = sshll.u32 %s1997_s5, 4  ;;  %s492_s10 = sshll.u32 %s1998_s28, 4  ;;  %s458_s18 = int_to_ptr.vmem [resolvable:$true] %s457_s18  ;;  %s493_s10 = int_to_ptr.vmem [resolvable:$true] %s492_s10 }
  0x84   : > { %s1784_s20 = scalar_lea.vmem %s458_s18, 256  ;;  %p2562_p8 = scmp.ne.s32.totalorder %s2550_s17, 0 }
  0x85   : > { %p1785_p6 = scmp.ne.s32.totalorder %s458_s18, %s1784_s20  ;;  %p1792_p5 = scmp.lt.s32.totalorder %s458_s18, %s458_s18 }
  0x86   : > { %p2563_p11 = pneg %p2562_p8  ;;  %p1793_p3 = scmp.lt.s32.totalorder %s1784_s20, %s1784_s20 }
  0x88   : > { %p1787_p12 = pnand %p1785_p6, %p2563_p11  ;;  %p1794_p7 = por %p1793_p3, %p1792_p5 }
  0x8a   : > { %p1788_p10 = pneg %p1787_p12 }
  0x8c   : > { %p1795_p2 = pnand %p1794_p7, %p1788_p10 }
  0x8e   : > { %1798 = shalt.err (!%p1795_p2)
}
  0x8f   : > { %s2564_s1 = smov 8   ;;  %s2565_s8 = smov 128  }
  0x90   : > { %s2566_s6 = sld [smem:[#allocation33_spill]]  ;;  %s1810_s15 = scalar_lea.vmem %s493_s10, 512 }
  0x91   : > { %p1811_p0 = scmp.ne.s32.totalorder %s493_s10, %s1810_s15  ;;  %p2567_p1 = pmov %p2563_p11 }
  0x92   : > { %p1818_p11 = scmp.lt.s32.totalorder %s493_s10, %s493_s10  ;;  %p1819_p12 = scmp.lt.s32.totalorder %s1810_s15, %s1810_s15 }
  0x93   : > { %p1813_p4 = pnand %p1811_p0, %p2567_p1 }
  0x94   : > { %p1820_p10 = por %p1819_p12, %p1818_p11 }
  0x95   : > { %p1814_p6 = pneg %p1813_p4 }
  0x96   : > { %1580 = dma.hbm_to_vmem [thread:$0]  (!%p2562_p8), %s2566_s6, 256, %s458_s18, [#allocation12], %s2565_s8, %s2565_s8, %s2564_s1  }
  0x97   : > { %p1821_p5 = pnand %p1820_p10, %p1814_p6 }
  0x99   : > { %1824 = shalt.err (!%p1821_p5)
}
  0x9a   : > { %s2568_s11 = sld [smem:[#allocation38_spill]]  ;;  %s522_s17 = scalar_lea.vmem [#allocation2], %s2189_s19 }
  0x9b   : > { %s2569_s28 = sld [smem:[#allocation29_spill]]  ;;  %s529_s13 = sshll.u32 %s522_s17, 4  ;;  %s530_s13 = int_to_ptr.vmem [resolvable:$true] %s529_s13 }
  0x9c   : > { %s2294_s7 = scalar_lea.hbm %s2495_s2, %s2192_s26  ;;  %s2570_s30 = sand.u32 1, %s1985_s23  }
  0x9d   : > { %s519_s3 = scalar_lea.sflag [#allocation3], %s2570_s30 }
  0xa0   : > { %1586 = dma.hbm_to_vmem [thread:$0]  (!%p2562_p8), %s2568_s11, 512, %s493_s10, [#allocation15], %s2565_s8, %s2565_s8, %s2564_s1  }
  0xa1   : > { %s2287_s20 = scalar_lea.hbm %s2569_s28, %s2192_s26  ;;  %s1830_s8 = scalar_lea.hbm %s2569_s28, 256 }
  0xa2   : > { %s1825_s6 = scalar_lea.hbm %s2287_s20, 128  ;;  %p1831_p2 = scmp.lt.s32.totalorder %s2287_s20, %s2569_s28 }
  0xa3   : > { %p1826_p8 = scmp.ne.s32.totalorder %s2287_s20, %s1825_s6  ;;  %p1832_p0 = scmp.lt.s32.totalorder %s1830_s8, %s1825_s6 }
  0xa5   : > { %p1828_p3 = pnand %p1826_p8, %p2214_p13  ;;  %p1833_p1 = por %p1832_p0, %p1831_p2 }
  0xa7   : > { %p1829_p7 = pneg %p1828_p3 }
  0xa9   : > { %p1834_p4 = pnand %p1833_p1, %p1829_p7 }
  0xab   : > { %1837 = shalt.err (!%p1834_p4)
}
  0xac   : > { %s1838_s17 = scalar_lea.vmem %s530_s13, 128  ;;  %s1999_s9 = smov [#allocation2]  }
  0xad   : > { %p1839_p6 = scmp.ne.s32.totalorder %s530_s13, %s1838_s17  ;;  %s1843_s15 = sshll.u32 %s1999_s9, 4  ;;  %s1844_s15 = int_to_ptr.vmem [resolvable:$false] %s1843_s15 }
  0xae   : > { %s1845_s30 = scalar_lea.vmem %s1844_s15, 256  ;;  %p1846_p10 = scmp.lt.s32.totalorder %s530_s13, %s1844_s15 }
  0xaf   : > { %p1841_p11 = pnand %p1839_p6, %p2214_p13  ;;  %p1847_p5 = scmp.lt.s32.totalorder %s1845_s30, %s1838_s17 }
  0xb1   : > { %p1842_p12 = pneg %p1841_p11  ;;  %p1848_p8 = por %p1847_p5, %p1846_p10 }
  0xb3   : > { %p1849_p3 = pnand %p1848_p8, %p1842_p12 }
  0xb5   : > { %1852 = shalt.err (!%p1849_p3)
}
  0xb6   : > { %1590 = dma.hbm_to_vmem [thread:$0]  (!%p2194_p9), %s2287_s20, 128, %s530_s13, %s519_s3  }
  0xb7   : > { %s558_s6 = scalar_lea.vmem [#allocation7], %s2189_s19  ;;  %s2319_s5 = scalar_lea.hbm %s2497_s4, %s2192_s26 }
  0xb8   : > { %s565_s10 = sshll.u32 %s558_s6, 4  ;;  %s1853_s18 = scalar_lea.hbm %s2294_s7, 128  ;;  %s566_s10 = int_to_ptr.vmem [resolvable:$true] %s565_s10 }
  0xb9   : > { %p1854_p7 = scmp.ne.s32.totalorder %s2294_s7, %s1853_s18  ;;  %s1858_s15 = scalar_lea.hbm %s2495_s2, 256 }
  0xba   : > { %p1859_p1 = scmp.lt.s32.totalorder %s2294_s7, %s2495_s2  ;;  %p1860_p4 = scmp.lt.s32.totalorder %s1858_s15, %s1853_s18 }
  0xbb   : > { %p1856_p2 = pnand %p1854_p7, %p2214_p13 }
  0xbc   : > { %p1861_p6 = por %p1860_p4, %p1859_p1 }
  0xbd   : > { %p1857_p0 = pneg %p1856_p2 }
  0xbf   : > { %p1862_p11 = pnand %p1861_p6, %p1857_p0 }
  0xc1   : > { %1865 = shalt.err (!%p1862_p11)
}
  0xc2   : > { %s1866_s3 = scalar_lea.vmem %s566_s10, 128  ;;  %s2000_s26 = smov [#allocation7]  }
  0xc3   : > { %p1867_p12 = scmp.ne.s32.totalorder %s566_s10, %s1866_s3  ;;  %s1871_s20 = sshll.u32 %s2000_s26, 4  ;;  %s1872_s20 = int_to_ptr.vmem [resolvable:$false] %s1871_s20 }
  0xc4   : > { %s1873_s13 = scalar_lea.vmem %s1872_s20, 256  ;;  %p1874_p8 = scmp.lt.s32.totalorder %s566_s10, %s1872_s20 }
  0xc5   : > { %p1869_p10 = pnand %p1867_p12, %p2214_p13  ;;  %p1875_p3 = scmp.lt.s32.totalorder %s1873_s13, %s1866_s3 }
  0xc7   : > { %p1870_p5 = pneg %p1869_p10  ;;  %p1876_p7 = por %p1875_p3, %p1874_p8 }
  0xc9   : > { %p1877_p2 = pnand %p1876_p7, %p1870_p5 }
  0xcb   : > { %1880 = shalt.err (!%p1877_p2)
}
  0xcc   : > { %1596 = dma.hbm_to_vmem [thread:$0]  (!%p2194_p9), %s2294_s7, 128, %s566_s10, %s2208_s21  }
  0xcd   : > { %s594_s11 = scalar_lea.vmem [#allocation10], %s2189_s19  ;;  %s1881_s1 = scalar_lea.hbm %s2319_s5, 128 }
  0xce   : > { %s601_s6 = sshll.u32 %s594_s11, 4  ;;  %p1882_p0 = scmp.ne.s32.totalorder %s2319_s5, %s1881_s1  ;;  %s602_s6 = int_to_ptr.vmem [resolvable:$true] %s601_s6 }
  0xcf   : > { %s1886_s17 = scalar_lea.hbm %s2497_s4, 256  ;;  %p1887_p6 = scmp.lt.s32.totalorder %s2319_s5, %s2497_s4 }
  0xd0   : > { %p1884_p1 = pnand %p1882_p0, %p2214_p13  ;;  %p1888_p11 = scmp.lt.s32.totalorder %s1886_s17, %s1881_s1 }
  0xd2   : > { %p1885_p4 = pneg %p1884_p1  ;;  %p1889_p12 = por %p1888_p11, %p1887_p6 }
  0xd4   : > { %p1890_p10 = pnand %p1889_p12, %p1885_p4 }
  0xd6   : > { %1893 = shalt.err (!%p1890_p10)
}
  0xd7   : > { %s1894_s21 = scalar_lea.vmem %s602_s6, 128  ;;  %s2001_s19 = smov [#allocation10]  }
  0xd8   : > { %p1895_p5 = scmp.ne.s32.totalorder %s602_s6, %s1894_s21  ;;  %s1899_s7 = sshll.u32 %s2001_s19, 4  ;;  %s1900_s7 = int_to_ptr.vmem [resolvable:$false] %s1899_s7 }
  0xd9   : > { %s1901_s10 = scalar_lea.vmem %s1900_s7, 256  ;;  %p1902_p7 = scmp.lt.s32.totalorder %s602_s6, %s1900_s7 }
  0xda   : > { %p1897_p8 = pnand %p1895_p5, %p2214_p13  ;;  %p1903_p2 = scmp.lt.s32.totalorder %s1901_s10, %s1894_s21 }
  0xdc   : > { %p1898_p3 = pneg %p1897_p8  ;;  %p1904_p0 = por %p1903_p2, %p1902_p7 }
  0xde   : > { %p1905_p1 = pnand %p1904_p0, %p1898_p3 }
  0xe0   : > { %1908 = shalt.err (!%p1905_p1)
}
  0xe1   : > { %1602 = dma.hbm_to_vmem [thread:$0]  (!%p2194_p9), %s2319_s5, 128, %s602_s6, %s2242_s16  }
  0xe2   : > { %p2571_p4 = scmp.ne.s32.totalorder %s2549_s29, 0 }
  0xe3   : > { %s2359_s14 = sand.u32 (!%p2571_p4), 1, %s1981_s22   ;;  %p2572_p13 = scmp.ne.s32.totalorder (!%p2571_p4), %s2546_s27, 0 }
  0xe4   : > { %610 = sbr.rel (%p2571_p4) target bundleno = 666 (0x29a), region = 84  ;;  %s2362_s30 = sshll.u32 (!%p2571_p4), %s2359_s14, 3 }
  0xe5   : > { %s613_s3 = scalar_lea.sflag (!%p2571_p4), [#allocation3], %s2359_s14  ;;  %s616_s26 = scalar_lea.vmem (!%p2571_p4), [#allocation2], %s2362_s30 }
  0xe9   : > { %1952 = dma.done.wait (%p2572_p13), %s613_s3, 128  }
  0xea   : > { %1954 = vsyncadd (%p2572_p13), %s613_s3, 4294967168  ;;  %s621_s29 = sand.u32 1, %s2111_s25   ;;  %s625_s16 = scalar_lea.vmem [#allocation5], %s2362_s30 }
  0xeb   : > { %s622_s0 = scalar_lea.sflag [#allocation6], %s621_s29 }
  0xec   : > { %1956 = dma.done.wait (%p2572_p13), %s622_s0, 256  }
  0xed   : > { %1958 = vsyncadd (%p2572_p13), %s622_s0, 4294967040  ;;  %s634_s5 = scalar_lea.vmem [#allocation7], %s2362_s30  ;;  %s640_s20 = scalar_lea.sflag [#allocation9], %s621_s29 }
  0xee   : > { %s643_s13 = scalar_lea.vmem [#allocation8], %s2362_s30 }
  0xef   : > { %1960 = dma.done.wait (%p2572_p13), %s640_s20, 256  }
  0xf0   : > { %1962 = vsyncadd (%p2572_p13), %s640_s20, 4294967040  ;;  %s652_s11 = scalar_lea.vmem [#allocation10], %s2362_s30  ;;  %p2573_p9 = scmp.eq.s32.totalorder %s2111_s25, 0 }
  0xf2   : > { %1964 = dma.done.wait (%p2573_p9), [#allocation12], 1280   ;;  %p2574_p6 = pmov %p2573_p9 }
  0xf4   : > { %1966 = vsyncadd (%p2574_p6), [#allocation12], 4294966016  ;;  %p2575_p11 = pmov %p2574_p6 }
  0xf5   : > { %p2576_p12 = pmov %p2574_p6 }
  0xf6   : > { %1968 = dma.done.wait (%p2575_p11), [#allocation15], 1024  }
  0xf7   : > { %1970 = vsyncadd (%p2576_p12), [#allocation15], 4294966272  ;;  %v2002_v0 = vmov 0.0   ;;  %vm2003_vm0 = vmmov 0   ;;  %v748_v1 = vld [vmem:[#allocation13 + $0x8] sm:$0xff]  ;;  %v745_v2 = vld [vmem:[#allocation11 + $0x38] sm:$0xff] }
  0xf8   : > { %1491 = vmatprep.subr.mxu0 %v2002_v0  ;;  %1498 = vmatprep.subr.mxu1 %v2002_v0  ;;  %v747_v3 = vld [vmem:[#allocation13] sm:$0xff]  ;;  %v744_v4 = vld [vmem:[#allocation11 + $0x30] sm:$0xff]  ;;  %vm749_vm1 = vcmask 130048   ;;  %v743_v6 = vld [vmem:[#allocation11 + $0x28] sm:$0xff]  ;;  %vm947_vm2 = vcmask 261120   ;;  %vm823_vm3 = vcmask 523264  }
  0xf9   : > { %1495 = vmatprep.mubr.msk.f32.mxu0 %vm2003_vm0, %v2002_v0  ;;  %1514 = vmatprep.mubr.msk.f32.mxu1 %vm2003_vm0, %v2002_v0  ;;  %v746_v5 = vld [vmem:[%s625_s16] sm:$0xff]  ;;  %v741_v10 = vld [vmem:[#allocation11 + $0x18] sm:$0xff]  ;;  %v740_v12 = vld [vmem:[#allocation11 + $0x10] sm:$0xff]  ;;  %s2577_s9 = sld [smem:[#allocation34_spill]]  ;;  %s1448_s3 = sshll.u32 %s2359_s14, 4 }
  0xfa   : > { %1492 = vmatpush3.msra.mxu0 %v748_v1  ;;  %1499 = vmatpush3.msra.mxu1 %v745_v2  ;;  %v946_v7 = vld [vmem:[#allocation16 + $0x18] sm:$0xff]  ;;  %v742_v8 = vld [vmem:[#allocation11 + $0x20] sm:$0xff]  ;;  %v944_v11 = vld [vmem:[#allocation16 + $0x8] sm:$0xff]  ;;  %s2578_s19 = sld [smem:[#allocation39_spill]]  ;;  %s736_s16 = scalar_lea.vmem [#allocation17], %s1448_s3 }
  0xfb   : > { %1493 = vmatprep.subr.mxu0 %v2002_v0  ;;  %1500 = vmatprep.subr.mxu1 %v2002_v0  ;;  %v945_v9 = vld [vmem:[#allocation16 + $0x10] sm:$0xff]  ;;  %v943_v13 = vld [vmem:[#allocation16] sm:$0xff]  ;;  %v739_v15 = vld [vmem:[#allocation11 + $0x8] sm:$0xff]  ;;  %s2579_s30 = sld [smem:[#allocation35_spill]]  ;;  %s1465_s8 = sshll.u32 %s2111_s25, 8 }
  0xfc   : > { %1494 = vmatpush3.msra.mxu0 %v747_v3  ;;  %1501 = vmatpush3.msra.mxu1 %v744_v4  ;;  %v942_v14 = vld [vmem:[%s643_s13] sm:$0xff]  ;;  %v737_v19 = vld [vmem:[%s616_s26] sm:$0xff]  ;;  %s2580_s0 = sld [smem:[#allocation36_spill]]  ;;  %s1227_s18 = sshll.u32 %s736_s16, 4  ;;  %s1228_s18 = int_to_ptr.vmem [resolvable:$true] %s1227_s18 }
  0xfd   : > { %1496 = vmatmul.mubr.msk.f32.vlgmr.msra.gmra.mxu0 %vm749_vm1, %v746_v5  ;;  %1502 = vmatprep.subr.mxu1 %v2002_v0  ;;  %v941_v16 = vld [vmem:[#allocation14 + $0x18] sm:$0xff]  ;;  %v738_v17 = vld [vmem:[#allocation11] sm:$0xff]  ;;  %v939_v20 = vld [vmem:[#allocation14 + $0x8] sm:$0xff]  ;;  %s2583_s1 = sld [smem:[#allocation41_spill]]  ;;  %s1909_s7 = scalar_lea.vmem %s1228_s18, 256 }
  0xfe   : > { %1517 = vmatprep.subr.mxu0 %v2002_v0  ;;  %1503 = vmatpush3.msra.mxu1 %v743_v6  ;;  %v940_v18 = vld [vmem:[#allocation14 + $0x10] sm:$0xff]  ;;  %v1096_v21 = vld [vmem:[%s2505_s12 + $0x8] sm:$0xff]  ;;  %v938_v22 = vld [vmem:[#allocation14] sm:$0xff]  ;;  %s2584_s15 = sld [smem:[#allocation42_spill]]  ;;  %p1910_p10 = scmp.ne.s32.totalorder %s1228_s18, %s1909_s7 }
  0xff   : > { %1518 = vmatpush3.msra.mxu0 %v946_v7  ;;  %1504 = vmatprep.subr.mxu1 %v2002_v0  ;;  %v1095_v23 = vld [vmem:[%s2505_s12] sm:$0xff]  ;;  %s2004_s10 = smov [#allocation17]  }
 0x100   : > { %1519 = vmatprep.subr.mxu0 %v2002_v0  ;;  %1505 = vmatpush3.msra.mxu1 %v742_v8  ;;  %v937_v24 = vld [vmem:[%s634_s5] sm:$0xff]  ;;  %s2581_s5 = sld [smem:[#allocation27_spill]] }
 0x101   : > { %1520 = vmatpush3.msra.mxu0 %v945_v9  ;;  %1506 = vmatprep.subr.mxu1 %v2002_v0  ;;  %v1094_v25 = vld [vmem:[%s652_s11] sm:$0xff]  ;;  %s2582_s11 = sld [smem:[#allocation40_spill]] }
 0x102   : > { %1521 = vmatprep.subr.mxu0 %v2002_v0  ;;  %1507 = vmatpush3.msra.mxu1 %v741_v10  ;;  %v1451_v31 = vld [vmem:[%s2577_s9] ss:$0 sm:$0xff] }
 0x103   : > { %1522 = vmatpush3.msra.mxu0 %v944_v11  ;;  %1508 = vmatprep.subr.mxu1 %v2002_v0  ;;  %v1457_v38 = vld [vmem:[%s2578_s19] ss:$0 sm:$0xff]  ;;  %s1213_s19 = scalar_lea.sflag [#allocation4], %s2359_s14 }
 0x104   : > { %1523 = vmatprep.subr.mxu0 %v2002_v0  ;;  %1509 = vmatpush3.msra.mxu1 %v740_v12  ;;  %v1452_v1 = vld [vmem:[%s2579_s30] ss:$0 sm:$0xff]  ;;  %s1225_s21 = scalar_lea.hbm %s2584_s15, %s1465_s8  ;;  %s1913_s30 = sshll.u32 %s2004_s10, 4  ;;  %s1914_s30 = int_to_ptr.vmem [resolvable:$false] %s1913_s30 }
 0x105   : > { %1524 = vmatpush3.msra.mxu0 %v943_v13  ;;  %1525 = vmatprep.mubr.msk.f32.mxu0 %vm2003_vm0, %v2002_v0  ;;  %v1453_v3 = vld [vmem:[%s2580_s0] ss:$0 sm:$0xff]  ;;  %s1915_s3 = scalar_lea.vmem %s1914_s30, 512  ;;  %p1916_p7 = scmp.lt.s32.totalorder %s1228_s18, %s1914_s30 }
 0x106   : > { %1510 = vmatprep.subr.mxu1 %v2002_v0  ;;  %1526 = vmatmul.mubr.msk.f32.vlgmr.msra.gmra.mxu0 %vm947_vm2, %v942_v14  ;;  %v1459_v10 = vld [vmem:[%s2583_s1] ss:$0 sm:$0xff]  ;;  %p2585_p5 = scmp.ne.s32.totalorder %s2581_s5, 0  ;;  %p1917_p2 = scmp.lt.s32.totalorder %s1915_s3, %s1909_s7 }
 0x107   : > { %1528 = vmatprep.subr.mxu0 %v2002_v0  ;;  %1511 = vmatpush3.msra.mxu1 %v739_v15  ;;  %v1458_v8 = vld [vmem:[%s2582_s11] ss:$0 sm:$0xff] }
 0x108   : > { %1529 = vmatpush3.msra.mxu0 %v941_v16  ;;  %1512 = vmatprep.subr.mxu1 %v2002_v0  ;;  %p1911_p8 = pnand %p1910_p10, %p2585_p5  ;;  %p1918_p0 = por %p1917_p2, %p1916_p7 }
 0x109   : > { %1530 = vmatprep.subr.mxu0 %v2002_v0  ;;  %1513 = vmatpush3.msra.mxu1 %v738_v17 }
 0x10a   : > { %1531 = vmatpush3.msra.mxu0 %v940_v18  ;;  %1515 = vmatmul.mubr.msk.f32.vlgmr.msra.gmra.mxu1 %vm823_vm3, %v737_v19  ;;  %p1912_p3 = pneg %p1911_p8 }
 0x10b   : > { %1532 = vmatprep.subr.mxu0 %v2002_v0  ;;  %1539 = vmatprep.subr.mxu1 %v2002_v0 }
 0x10c   : > { %1533 = vmatpush3.msra.mxu0 %v939_v20  ;;  %1540 = vmatpush3.msra.mxu1 %v1096_v21  ;;  %p1919_p1 = pnand %p1918_p0, %p1912_p3 }
 0x10d   : > { %1534 = vmatprep.subr.mxu0 %v2002_v0  ;;  %1541 = vmatprep.subr.mxu1 %v2002_v0 }
 0x10e   : > { %1535 = vmatpush3.msra.mxu0 %v938_v22  ;;  %1536 = vmatprep.mubr.msk.f32.mxu0 %vm2003_vm0, %v2002_v0 }
 0x10f   : > { %1542 = vmatpush3.msra.mxu1 %v1095_v23  ;;  %1543 = vmatprep.mubr.msk.f32.mxu1 %vm2003_vm0, %v2002_v0 }
 0x110   : > { %1537 = vmatmul.mubr.msk.f32.vlgmr.msra.gmra.mxu0 %vm947_vm2, %v937_v24  ;;  %1544 = vmatmul.mubr.msk.f32.vlgmr.msra.gmra.mxu1 %vm749_vm1, %v1094_v25 }
 0x1bd   : > { %v819_v26 = vpop.f32.mrf.mxu0 }
 0x1bf   : > { %v1497_v27 = vpop.f32.mrf.mxu0 }
 0x1c6   : > { %v1017_v28 = vpop.f32.mrf.mxu0 }
 0x1c8   : > { %v1527_v29 = vpop.f32.mrf.mxu0 }
 0x1ca   : > { %v893_v30 = vpop.f32.mrf.mxu1 }
 0x1cb   : > { %v894_v32 = vadd.f32 %v893_v30, %v819_v26 }
 0x1cc   : > { %v1516_v33 = vpop.f32.mrf.mxu1 }
 0x1cd   : > { %v904_v34 = vadd.f32 %v1451_v31, %v894_v32 }
 0x1cf   : > { %1657 = vtanh.f32 %v904_v34 }
 0x1d0   : > { %v1090_v35 = vpop.f32.mrf.mxu0  ;;  %v1166_v36 = vpop.f32.mrf.mxu1 }
 0x1d1   : > { %v1091_v37 = vadd.f32 %v1090_v35, %v1017_v28 }
 0x1d2   : > { %v1538_v39 = vpop.f32.mrf.mxu0  ;;  %v1545_v40 = vpop.f32.mrf.mxu1 }
 0x1d3   : > { %v1170_v41 = vadd.f32 %v1166_v36, %v1091_v37 }
 0x1d5   : > { %v1178_v42 = vadd.f32 %v1457_v38, %v1170_v41 }
 0x1d7   : > { %1659 = vtanh.f32 %v1178_v42 }
 0x1dc   : > { %v1658_v43 = vpop.eup %1657 }
 0x1dd   : > { %908 = vadd.xlane.f32.xlu0 %v1658_v43  ;;  %v912_v44 = vmul.f32 %v1658_v43, %v1658_v43 }
 0x1df   : > { %913 = vadd.xlane.f32.xlu1 %v912_v44 }
 0x1e4   : > { %v1660_v45 = vpop.eup %1659 }
 0x1e5   : > { %1182 = vadd.xlane.f32.xlu0 %v1660_v45  ;;  %v1185_v46 = vmul.f32 %v1660_v45, %v1660_v45 }
 0x1e7   : > { %1186 = vadd.xlane.f32.xlu1 %v1185_v46 }
 0x266   : > { %v909_v47 = vpop.xlane.xlu0 %908 }
 0x267   : > { %v911_v48 = vmul.f32 0.0078125, %v909_v47 }
 0x268   : > { %v914_v49 = vpop.xlane.xlu1 %913 }
 0x269   : > { %v916_v50 = vmul.f32 %v911_v48, %v911_v48  ;;  %v915_v51 = vmul.f32 0.0078125, %v914_v49  ;;  %v919_v63 = vsub.f32 %v1658_v43, %v911_v48 }
 0x26b   : > { %v917_v52 = vsub.f32 %v915_v51, %v916_v50 }
 0x26d   : > { %v918_v53 = vmax.f32 %v917_v52, 0.0 }
 0x26e   : > { %v1183_v54 = vpop.xlane.xlu0 %1182 }
 0x26f   : > { %v920_v55 = vadd.f32 1e-05, %v918_v53  ;;  %v1184_v56 = vmul.f32 0.0078125, %v1183_v54 }
 0x270   : > { %v1187_v57 = vpop.xlane.xlu1 %1186 }
 0x271   : > { %1661 = vrsqrt.f32 %v920_v55  ;;  %v1189_v58 = vmul.f32 %v1184_v56, %v1184_v56  ;;  %v1188_v59 = vmul.f32 0.0078125, %v1187_v57  ;;  %v1192_v6 = vsub.f32 %v1660_v45, %v1184_v56 }
 0x273   : > { %v1190_v60 = vsub.f32 %v1188_v59, %v1189_v58 }
 0x275   : > { %v1191_v61 = vmax.f32 %v1190_v60, 0.0 }
 0x277   : > { %v1193_v62 = vadd.f32 1e-05, %v1191_v61 }
 0x279   : > { %1663 = vrsqrt.f32 %v1193_v62 }
 0x27e   : > { %v1662_v0 = vpop.eup %1661 }
 0x27f   : > { %v922_v2 = vmul.f32 %v1662_v0, %v919_v63 }
 0x281   : > { %v929_v4 = vmul.f32 %v1452_v1, %v922_v2 }
 0x283   : > { %v936_v5 = vadd.f32 %v1453_v3, %v929_v4 }
 0x285   : > { %1210 = vst [vmem:[%s736_s16] sm:$0xff] %v936_v5 }
 0x286   : > { %v1664_v7 = vpop.eup %1663 }
 0x287   : > { %v1195_v9 = vmul.f32 %v1664_v7, %v1192_v6 }
 0x289   : > { %v1202_v11 = vmul.f32 %v1458_v8, %v1195_v9 }
 0x28b   : > { %v1209_v12 = vadd.f32 %v1459_v10, %v1202_v11 }
 0x28d   : > { %1211 = vst [vmem:[%s736_s16 + $0x8] sm:$0xff] %v1209_v12 }
 0x28e   : > { %1922 = shalt.err (!%p1919_p1)
}
 0x28f   : > { %s1923_s25 = scalar_lea.hbm %s1225_s21, 256  ;;  %s1927_s29 = scalar_lea.hbm %s2584_s15, 512 }
 0x290   : > { %p1924_p4 = scmp.ne.s32.totalorder %s1225_s21, %s1923_s25  ;;  %p1928_p6 = scmp.lt.s32.totalorder %s1225_s21, %s2584_s15 }
 0x291   : > { %p1929_p11 = scmp.lt.s32.totalorder %s1927_s29, %s1923_s25 }
 0x292   : > { %p1925_p13 = pnand %p1924_p4, %p2585_p5 }
 0x293   : > { %p1930_p12 = por %p1929_p11, %p1928_p6 }
 0x294   : > { %p1926_p9 = pneg %p1925_p13 }
 0x296   : > { %p1931_p10 = pnand %p1930_p12, %p1926_p9 }
 0x298   : > { %1934 = shalt.err (!%p1931_p10)
}
 0x299   : > { %1572 = dma.vmem_to_hbm [thread:$0]  (%p2585_p5), %s1228_s18, 256, %s1225_s21, %s1213_s19  }
 0x29a PF: > { %s2586_s20 = sld [smem:[#allocation24_spill]]  ;;  %p2589_p3 = scmp.ge.s32.totalorder %s1989_s24, 2 }
 0x29b   : > { %s2587_s13 = sld [smem:[#allocation25_spill]] }
 0x2a0   : > { %s1239_s11 = sand.u32 1, %s2586_s20  }
 0x2a1   : > { %p2588_p8 = scmp.ne.s32.totalorder %s2587_s13, 0  ;;  %s1240_s27 = scalar_lea.sflag [#allocation4], %s1239_s11 }
 0x2a3   : > { %p1604_p7 = pnand %p2589_p3, %p2588_p8 }
 0x2a5   : > { %p1605_p2 = pneg %p1604_p7 }
 0x2a7   : > { %1972 = dma.done.wait (%p1605_p2), %s1240_s27, 256  }
 0x2a8   : > { %1974 = vsyncadd (%p1605_p2), %s1240_s27, 4294967040  ;;  %s2590_s24 = sld [smem:[#allocation26_spill]]  ;;  %s2592_s21 = smov %s1981_s22 }
 0x2a9   : > { %s2591_s6 = sld [smem:[#allocation28_spill]]  ;;  %s2593_s22 = smov %s1985_s23 }
 0x2ae   : > { %p37_p0 = scmp.ge.s32.totalorder %s2590_s24, 4  }
 0x2af   : > { %s2594_s23 = smov %s2591_s6 }
 0x2b0   :  { %39 = sbr.rel (!%p37_p0) target bundleno = 26 (0x1a), region = 193 }
 0x2b5   :  { %1245 = vsyncpa [#allocation3], 1 }
 0x2b6   :  { %1247 = vsyncpa [#allocation3 + $0x1], 1 }
 0x2b7   :  { %1248 = vsyncpa [#allocation6], 1 }
 0x2b8   :  { %1250 = vsyncpa [#allocation6 + $0x1], 1 }
 0x2b9   :  { %1251 = vsyncpa [#allocation9], 1 }
 0x2ba   :  { %1253 = vsyncpa [#allocation9 + $0x1], 1 }
 0x2bb   :  { %1254 = vsyncpa [#allocation12], 1 }
 0x2bc   :  { %1255 = vsyncpa [#allocation15], 1 }
 0x2bd   :  { %1256 = vsyncpa [#allocation4], 1 }
 0x2be   :  { %1258 = vsyncpa [#allocation4 + $0x1], 1 }

</bundles_post_ra>
